<compile_context>
chip_gen: v6e
topology: v6e:2x2x1
jax: 0.10.0
libtpu: 0.0.40
codegen_flags: <defaults>
</compile_context>

<pallas_src>
import functools

import jax
import jax.numpy as jnp
from jax.experimental import pallas as pl
from jax.experimental.pallas import tpu as pltpu


# ----------------------------------------------------------------------------
# Fused kernel: one batch element per grid step.
#   x_ref:     (N, C)        activations for this batch element
#   wqkv_ref:  (C, 3C)       pre-transposed qkv weight (resident)
#   wproj_ref: (C, C)        pre-transposed proj weight (resident)
#   bproj_ref: (1, C)        proj bias (resident)
#   o_ref:     (N, C)        output for this batch element
# ----------------------------------------------------------------------------
def _fused_attention_kernel(x_ref, wqkv_ref, wproj_ref, bproj_ref, o_ref,
                            *, num_heads, scale, compute_dtype):
    N, C = x_ref.shape
    H = num_heads
    Dh = C // H

    x = x_ref[...].astype(compute_dtype)                       # (N, C)

    # qkv projection (qkv_bias=False -> no bias).  f32 accumulation.
    qkv = jnp.dot(x, wqkv_ref[...].astype(compute_dtype),
                  preferred_element_type=jnp.float32)           # (N, 3C) f32

    # Per-head attention; heads stay packed along lanes (static loop, static
    # lane slices -> no layout transposes, no HBM traffic between stages).
    head_outs = []
    for h in range(H):
        q = qkv[:, h * Dh:(h + 1) * Dh] * scale                 # (N, Dh) f32
        k = qkv[:, C + h * Dh:C + (h + 1) * Dh]                 # (N, Dh) f32
        v = qkv[:, 2 * C + h * Dh:2 * C + (h + 1) * Dh]         # (N, Dh) f32

        # scores = q @ k^T  (contract the last dims -> no explicit transpose)
        s = jax.lax.dot_general(q.astype(compute_dtype), k.astype(compute_dtype),
                                (((1,), (1,)), ((), ())),
                                preferred_element_type=jnp.float32)   # (N, N)

        # Numerically stable softmax in f32; divide replaced by recip * mul.
        s = s - jnp.max(s, axis=-1, keepdims=True)
        p = jnp.exp(s)
        inv = pl.reciprocal(jnp.sum(p, axis=-1, keepdims=True), approx=False)
        p = p * inv

        o_h = jnp.dot(p.astype(compute_dtype), v.astype(compute_dtype),
                      preferred_element_type=jnp.float32)       # (N, Dh) f32
        head_outs.append(o_h)

    o_all = jnp.concatenate(head_outs, axis=-1)                 # (N, C) f32

    # Output projection (with bias), fused before the single HBM writeback.
    out = jnp.dot(o_all.astype(compute_dtype), wproj_ref[...].astype(compute_dtype),
                  preferred_element_type=jnp.float32)
    out = out + bproj_ref[...].astype(jnp.float32)
    o_ref[...] = out.astype(o_ref.dtype)


# ----------------------------------------------------------------------------
# Parameter prep (done once, outside the per-call forward): transpose the
# PyTorch-convention weights so the kernel never pays a per-call transpose.
# ----------------------------------------------------------------------------
def prepare_params(w_qkv, w_proj, b_proj):
    """w_qkv: (3C, C), w_proj: (C, C), b_proj: (C,)  -> kernel-ready params."""
    return jnp.transpose(w_qkv), jnp.transpose(w_proj), b_proj


# ----------------------------------------------------------------------------
# Full Attention_resize forward (takes pre-transposed weights).
# ----------------------------------------------------------------------------
def attention_resize_forward(x, w_qkv_t, w_proj_t, b_proj, *, num_heads,
                             compute_dtype=None):
    B, N, C = x.shape
    H = num_heads
    assert C % H == 0, "dim should be divisible by num_heads"
    Dh = C // H
    assert w_qkv_t.shape == (C, 3 * C)
    assert w_proj_t.shape == (C, C)
    assert b_proj.shape == (C,)
    scale = Dh ** -0.5
    if compute_dtype is None:
        compute_dtype = x.dtype

    b2 = b_proj.reshape(1, C)

    kern = functools.partial(_fused_attention_kernel, num_heads=H, scale=scale,
                             compute_dtype=compute_dtype)

    return pl.pallas_call(
        kern,
        out_shape=jax.ShapeDtypeStruct((B, N, C), x.dtype),
        grid_spec=pltpu.PrefetchScalarGridSpec(
            num_scalar_prefetch=0,
            grid=(B,),
            in_specs=[
                pl.BlockSpec((None, N, C), lambda b: (b, 0, 0)),   # x (streamed)
                pl.BlockSpec((C, 3 * C), lambda b: (0, 0)),        # w_qkv^T (resident)
                pl.BlockSpec((C, C), lambda b: (0, 0)),            # w_proj^T (resident)
                pl.BlockSpec((1, C), lambda b: (0, 0)),            # bias (resident)
            ],
            out_specs=pl.BlockSpec((None, N, C), lambda b: (b, 0, 0)),
        ),
        compiler_params=pltpu.CompilerParams(
            dimension_semantics=("parallel",),
            vmem_limit_bytes=64 * 1024 * 1024,   # valid on v5e/v6e/v7x
        ),
    )(x, w_qkv_t, w_proj_t, b2)


if __name__ == "__main__":
    key = jax.random.PRNGKey(0)

    # Small shapes consistent with the module: batch=2, seq=8, dim=64, 8 heads.
    B, N, C, H = 2, 8, 64, 8

    k1, k2, k3, k4 = jax.random.split(key, 4)
    x = jax.random.normal(k1, (B, N, C), dtype=jnp.float32)
    w_qkv = jax.random.normal(k2, (3 * C, C), dtype=jnp.float32) / jnp.sqrt(C)
    w_proj = jax.random.normal(k3, (C, C), dtype=jnp.float32) / jnp.sqrt(C)
    b_proj = 0.02 * jax.random.normal(k4, (C,), dtype=jnp.float32)

    # One-time weight prep (amortized over all forward calls).
    w_qkv_t, w_proj_t, b_proj_p = prepare_params(w_qkv, w_proj, b_proj)

    out = attention_resize_forward(x, w_qkv_t, w_proj_t, b_proj_p, num_heads=H)
    out = jax.block_until_ready(out)

    # Pure-JAX reference of the PyTorch forward (eval mode).
    def ref(x):
        Dh = C // H
        qkv = (x @ w_qkv.T).reshape(B, N, 3, H, Dh).transpose(2, 0, 3, 1, 4)
        q, k, v = qkv[0], qkv[1], qkv[2]
        q = q * (Dh ** -0.5)
        attn = jax.nn.softmax(q @ jnp.swapaxes(k, -2, -1), axis=-1)
        o = (attn @ v).transpose(0, 2, 1, 3).reshape(B, N, C)
        return o @ w_proj.T + b_proj

    r = ref(x)
    assert out.shape == (B, N, C)
    assert out.dtype == x.dtype
    assert jnp.allclose(out, r, atol=1e-5, rtol=1e-5), float(jnp.max(jnp.abs(out - r)))

    print("KERNEL_OK")
</pallas_src>

<mosaic_0001>
module attributes {stable_mosaic.version = 11 : i64} {
  func.func @_fused_attention_kernel(%arg0: i32, %arg1: memref<1x8x64xf32, #tpu.memory_space<vmem>>, %arg2: memref<64x192xf32, #tpu.memory_space<vmem>>, %arg3: memref<64x64xf32, #tpu.memory_space<vmem>>, %arg4: memref<1x64xf32, #tpu.memory_space<vmem>>, %arg5: memref<1x8x64xf32, #tpu.memory_space<vmem>>) attributes {dimension_semantics = [#tpu.dimension_semantics<parallel>], iteration_bounds = array<i64: 2>, scalar_prefetch = 0 : i64, scratch_operands = 0 : i64, tpu.core_type = #tpu.core_type<tc>, window_params = [{transform_indices = @transform_0, window_bounds = array<i64: 1, 8, 64>}, {pipeline_mode = #tpu.pipeline_mode<synchronous>, transform_indices = @transform_1, window_bounds = array<i64: 64, 192>}, {pipeline_mode = #tpu.pipeline_mode<synchronous>, transform_indices = @transform_2, window_bounds = array<i64: 64, 64>}, {pipeline_mode = #tpu.pipeline_mode<synchronous>, transform_indices = @transform_3, window_bounds = array<i64: 1, 64>}, {transform_indices = @transform_4, window_bounds = array<i64: 1, 8, 64>}]} {
    %c0 = arith.constant 0 : index
    %c0_0 = arith.constant 0 : index
    %c0_1 = arith.constant 0 : index
    %0 = vector.load %arg1[%c0, %c0_0, %c0_1] : memref<1x8x64xf32, #tpu.memory_space<vmem>>, vector<1x8x64xf32>
    %1 = vector.shape_cast %0 : vector<1x8x64xf32> to vector<8x64xf32>
    %c0_2 = arith.constant 0 : index
    %c0_3 = arith.constant 0 : index
    %2 = vector.load %arg2[%c0_2, %c0_3] : memref<64x192xf32, #tpu.memory_space<vmem>>, vector<64x192xf32>
    %cst = arith.constant dense<0.000000e+00> : vector<8x192xf32>
    %3 = tpu.matmul %1, %2, %cst {dimension_numbers = #tpu.dot_dimension_numbers<[1], [0], [0], [1], [0, 0, 1, 1], [], []>} : vector<8x64xf32>, vector<64x192xf32>, vector<8x192xf32> -> vector<8x192xf32>
    %4 = vector.extract_strided_slice %3 {offsets = [0, 0], sizes = [8, 8], strides = [1, 1]} : vector<8x192xf32> to vector<8x8xf32>
    %cst_4 = arith.constant 0.353553385 : f32
    %5 = vector.broadcast %cst_4 : f32 to vector<8x8xf32>
    %6 = arith.mulf %4, %5 : vector<8x8xf32>
    %7 = vector.extract_strided_slice %3 {offsets = [0, 64], sizes = [8, 8], strides = [1, 1]} : vector<8x192xf32> to vector<8x8xf32>
    %8 = vector.extract_strided_slice %3 {offsets = [0, 128], sizes = [8, 8], strides = [1, 1]} : vector<8x192xf32> to vector<8x8xf32>
    %cst_5 = arith.constant dense<0.000000e+00> : vector<8x8xf32>
    %9 = tpu.matmul %6, %7, %cst_5 {dimension_numbers = #tpu.dot_dimension_numbers<[1], [1], [0], [0], [0, 0, 1, 0], [], []>} : vector<8x8xf32>, vector<8x8xf32>, vector<8x8xf32> -> vector<8x8xf32>
    %cst_6 = arith.constant dense<0xFF800000> : vector<8xf32>
    %10 = vector.multi_reduction <maximumf>, %9, %cst_6 [1] : vector<8x8xf32> to vector<8xf32>
    %11 = vector.shape_cast %10 : vector<8xf32> to vector<8x1xf32>
    %12 = vector.broadcast %11 : vector<8x1xf32> to vector<8x8xf32>
    %13 = arith.subf %9, %12 : vector<8x8xf32>
    %14 = math.exp %13 : vector<8x8xf32>
    %cst_7 = arith.constant dense<0.000000e+00> : vector<8xf32>
    %15 = vector.multi_reduction <add>, %14, %cst_7 [1] : vector<8x8xf32> to vector<8xf32>
    %16 = vector.shape_cast %15 : vector<8xf32> to vector<8x1xf32>
    %17 = tpu.reciprocal %16 : vector<8x1xf32> -> vector<8x1xf32>
    %18 = vector.broadcast %17 : vector<8x1xf32> to vector<8x8xf32>
    %19 = arith.mulf %14, %18 : vector<8x8xf32>
    %cst_8 = arith.constant dense<0.000000e+00> : vector<8x8xf32>
    %20 = tpu.matmul %19, %8, %cst_8 {dimension_numbers = #tpu.dot_dimension_numbers<[1], [0], [0], [1], [0, 0, 1, 1], [], []>} : vector<8x8xf32>, vector<8x8xf32>, vector<8x8xf32> -> vector<8x8xf32>
    %21 = vector.extract_strided_slice %3 {offsets = [0, 8], sizes = [8, 8], strides = [1, 1]} : vector<8x192xf32> to vector<8x8xf32>
    %cst_9 = arith.constant 0.353553385 : f32
    %22 = vector.broadcast %cst_9 : f32 to vector<8x8xf32>
    %23 = arith.mulf %21, %22 : vector<8x8xf32>
    %24 = vector.extract_strided_slice %3 {offsets = [0, 72], sizes = [8, 8], strides = [1, 1]} : vector<8x192xf32> to vector<8x8xf32>
    %25 = vector.extract_strided_slice %3 {offsets = [0, 136], sizes = [8, 8], strides = [1, 1]} : vector<8x192xf32> to vector<8x8xf32>
    %cst_10 = arith.constant dense<0.000000e+00> : vector<8x8xf32>
    %26 = tpu.matmul %23, %24, %cst_10 {dimension_numbers = #tpu.dot_dimension_numbers<[1], [1], [0], [0], [0, 0, 1, 0], [], []>} : vector<8x8xf32>, vector<8x8xf32>, vector<8x8xf32> -> vector<8x8xf32>
    %cst_11 = arith.constant dense<0xFF800000> : vector<8xf32>
    %27 = vector.multi_reduction <maximumf>, %26, %cst_11 [1] : vector<8x8xf32> to vector<8xf32>
    %28 = vector.shape_cast %27 : vector<8xf32> to vector<8x1xf32>
    %29 = vector.broadcast %28 : vector<8x1xf32> to vector<8x8xf32>
    %30 = arith.subf %26, %29 : vector<8x8xf32>
    %31 = math.exp %30 : vector<8x8xf32>
    %cst_12 = arith.constant dense<0.000000e+00> : vector<8xf32>
    %32 = vector.multi_reduction <add>, %31, %cst_12 [1] : vector<8x8xf32> to vector<8xf32>
    %33 = vector.shape_cast %32 : vector<8xf32> to vector<8x1xf32>
    %34 = tpu.reciprocal %33 : vector<8x1xf32> -> vector<8x1xf32>
    %35 = vector.broadcast %34 : vector<8x1xf32> to vector<8x8xf32>
    %36 = arith.mulf %31, %35 : vector<8x8xf32>
    %cst_13 = arith.constant dense<0.000000e+00> : vector<8x8xf32>
    %37 = tpu.matmul %36, %25, %cst_13 {dimension_numbers = #tpu.dot_dimension_numbers<[1], [0], [0], [1], [0, 0, 1, 1], [], []>} : vector<8x8xf32>, vector<8x8xf32>, vector<8x8xf32> -> vector<8x8xf32>
    %38 = vector.extract_strided_slice %3 {offsets = [0, 16], sizes = [8, 8], strides = [1, 1]} : vector<8x192xf32> to vector<8x8xf32>
    %cst_14 = arith.constant 0.353553385 : f32
    %39 = vector.broadcast %cst_14 : f32 to vector<8x8xf32>
    %40 = arith.mulf %38, %39 : vector<8x8xf32>
    %41 = vector.extract_strided_slice %3 {offsets = [0, 80], sizes = [8, 8], strides = [1, 1]} : vector<8x192xf32> to vector<8x8xf32>
    %42 = vector.extract_strided_slice %3 {offsets = [0, 144], sizes = [8, 8], strides = [1, 1]} : vector<8x192xf32> to vector<8x8xf32>
    %cst_15 = arith.constant dense<0.000000e+00> : vector<8x8xf32>
    %43 = tpu.matmul %40, %41, %cst_15 {dimension_numbers = #tpu.dot_dimension_numbers<[1], [1], [0], [0], [0, 0, 1, 0], [], []>} : vector<8x8xf32>, vector<8x8xf32>, vector<8x8xf32> -> vector<8x8xf32>
    %cst_16 = arith.constant dense<0xFF800000> : vector<8xf32>
    %44 = vector.multi_reduction <maximumf>, %43, %cst_16 [1] : vector<8x8xf32> to vector<8xf32>
    %45 = vector.shape_cast %44 : vector<8xf32> to vector<8x1xf32>
    %46 = vector.broadcast %45 : vector<8x1xf32> to vector<8x8xf32>
    %47 = arith.subf %43, %46 : vector<8x8xf32>
    %48 = math.exp %47 : vector<8x8xf32>
    %cst_17 = arith.constant dense<0.000000e+00> : vector<8xf32>
    %49 = vector.multi_reduction <add>, %48, %cst_17 [1] : vector<8x8xf32> to vector<8xf32>
    %50 = vector.shape_cast %49 : vector<8xf32> to vector<8x1xf32>
    %51 = tpu.reciprocal %50 : vector<8x1xf32> -> vector<8x1xf32>
    %52 = vector.broadcast %51 : vector<8x1xf32> to vector<8x8xf32>
    %53 = arith.mulf %48, %52 : vector<8x8xf32>
    %cst_18 = arith.constant dense<0.000000e+00> : vector<8x8xf32>
    %54 = tpu.matmul %53, %42, %cst_18 {dimension_numbers = #tpu.dot_dimension_numbers<[1], [0], [0], [1], [0, 0, 1, 1], [], []>} : vector<8x8xf32>, vector<8x8xf32>, vector<8x8xf32> -> vector<8x8xf32>
    %55 = vector.extract_strided_slice %3 {offsets = [0, 24], sizes = [8, 8], strides = [1, 1]} : vector<8x192xf32> to vector<8x8xf32>
    %cst_19 = arith.constant 0.353553385 : f32
    %56 = vector.broadcast %cst_19 : f32 to vector<8x8xf32>
    %57 = arith.mulf %55, %56 : vector<8x8xf32>
    %58 = vector.extract_strided_slice %3 {offsets = [0, 88], sizes = [8, 8], strides = [1, 1]} : vector<8x192xf32> to vector<8x8xf32>
    %59 = vector.extract_strided_slice %3 {offsets = [0, 152], sizes = [8, 8], strides = [1, 1]} : vector<8x192xf32> to vector<8x8xf32>
    %cst_20 = arith.constant dense<0.000000e+00> : vector<8x8xf32>
    %60 = tpu.matmul %57, %58, %cst_20 {dimension_numbers = #tpu.dot_dimension_numbers<[1], [1], [0], [0], [0, 0, 1, 0], [], []>} : vector<8x8xf32>, vector<8x8xf32>, vector<8x8xf32> -> vector<8x8xf32>
    %cst_21 = arith.constant dense<0xFF800000> : vector<8xf32>
    %61 = vector.multi_reduction <maximumf>, %60, %cst_21 [1] : vector<8x8xf32> to vector<8xf32>
    %62 = vector.shape_cast %61 : vector<8xf32> to vector<8x1xf32>
    %63 = vector.broadcast %62 : vector<8x1xf32> to vector<8x8xf32>
    %64 = arith.subf %60, %63 : vector<8x8xf32>
    %65 = math.exp %64 : vector<8x8xf32>
    %cst_22 = arith.constant dense<0.000000e+00> : vector<8xf32>
    %66 = vector.multi_reduction <add>, %65, %cst_22 [1] : vector<8x8xf32> to vector<8xf32>
    %67 = vector.shape_cast %66 : vector<8xf32> to vector<8x1xf32>
    %68 = tpu.reciprocal %67 : vector<8x1xf32> -> vector<8x1xf32>
    %69 = vector.broadcast %68 : vector<8x1xf32> to vector<8x8xf32>
    %70 = arith.mulf %65, %69 : vector<8x8xf32>
    %cst_23 = arith.constant dense<0.000000e+00> : vector<8x8xf32>
    %71 = tpu.matmul %70, %59, %cst_23 {dimension_numbers = #tpu.dot_dimension_numbers<[1], [0], [0], [1], [0, 0, 1, 1], [], []>} : vector<8x8xf32>, vector<8x8xf32>, vector<8x8xf32> -> vector<8x8xf32>
    %72 = vector.extract_strided_slice %3 {offsets = [0, 32], sizes = [8, 8], strides = [1, 1]} : vector<8x192xf32> to vector<8x8xf32>
    %cst_24 = arith.constant 0.353553385 : f32
    %73 = vector.broadcast %cst_24 : f32 to vector<8x8xf32>
    %74 = arith.mulf %72, %73 : vector<8x8xf32>
    %75 = vector.extract_strided_slice %3 {offsets = [0, 96], sizes = [8, 8], strides = [1, 1]} : vector<8x192xf32> to vector<8x8xf32>
    %76 = vector.extract_strided_slice %3 {offsets = [0, 160], sizes = [8, 8], strides = [1, 1]} : vector<8x192xf32> to vector<8x8xf32>
    %cst_25 = arith.constant dense<0.000000e+00> : vector<8x8xf32>
    %77 = tpu.matmul %74, %75, %cst_25 {dimension_numbers = #tpu.dot_dimension_numbers<[1], [1], [0], [0], [0, 0, 1, 0], [], []>} : vector<8x8xf32>, vector<8x8xf32>, vector<8x8xf32> -> vector<8x8xf32>
    %cst_26 = arith.constant dense<0xFF800000> : vector<8xf32>
    %78 = vector.multi_reduction <maximumf>, %77, %cst_26 [1] : vector<8x8xf32> to vector<8xf32>
    %79 = vector.shape_cast %78 : vector<8xf32> to vector<8x1xf32>
    %80 = vector.broadcast %79 : vector<8x1xf32> to vector<8x8xf32>
    %81 = arith.subf %77, %80 : vector<8x8xf32>
    %82 = math.exp %81 : vector<8x8xf32>
    %cst_27 = arith.constant dense<0.000000e+00> : vector<8xf32>
    %83 = vector.multi_reduction <add>, %82, %cst_27 [1] : vector<8x8xf32> to vector<8xf32>
    %84 = vector.shape_cast %83 : vector<8xf32> to vector<8x1xf32>
    %85 = tpu.reciprocal %84 : vector<8x1xf32> -> vector<8x1xf32>
    %86 = vector.broadcast %85 : vector<8x1xf32> to vector<8x8xf32>
    %87 = arith.mulf %82, %86 : vector<8x8xf32>
    %cst_28 = arith.constant dense<0.000000e+00> : vector<8x8xf32>
    %88 = tpu.matmul %87, %76, %cst_28 {dimension_numbers = #tpu.dot_dimension_numbers<[1], [0], [0], [1], [0, 0, 1, 1], [], []>} : vector<8x8xf32>, vector<8x8xf32>, vector<8x8xf32> -> vector<8x8xf32>
    %89 = vector.extract_strided_slice %3 {offsets = [0, 40], sizes = [8, 8], strides = [1, 1]} : vector<8x192xf32> to vector<8x8xf32>
    %cst_29 = arith.constant 0.353553385 : f32
    %90 = vector.broadcast %cst_29 : f32 to vector<8x8xf32>
    %91 = arith.mulf %89, %90 : vector<8x8xf32>
    %92 = vector.extract_strided_slice %3 {offsets = [0, 104], sizes = [8, 8], strides = [1, 1]} : vector<8x192xf32> to vector<8x8xf32>
    %93 = vector.extract_strided_slice %3 {offsets = [0, 168], sizes = [8, 8], strides = [1, 1]} : vector<8x192xf32> to vector<8x8xf32>
    %cst_30 = arith.constant dense<0.000000e+00> : vector<8x8xf32>
    %94 = tpu.matmul %91, %92, %cst_30 {dimension_numbers = #tpu.dot_dimension_numbers<[1], [1], [0], [0], [0, 0, 1, 0], [], []>} : vector<8x8xf32>, vector<8x8xf32>, vector<8x8xf32> -> vector<8x8xf32>
    %cst_31 = arith.constant dense<0xFF800000> : vector<8xf32>
    %95 = vector.multi_reduction <maximumf>, %94, %cst_31 [1] : vector<8x8xf32> to vector<8xf32>
    %96 = vector.shape_cast %95 : vector<8xf32> to vector<8x1xf32>
    %97 = vector.broadcast %96 : vector<8x1xf32> to vector<8x8xf32>
    %98 = arith.subf %94, %97 : vector<8x8xf32>
    %99 = math.exp %98 : vector<8x8xf32>
    %cst_32 = arith.constant dense<0.000000e+00> : vector<8xf32>
    %100 = vector.multi_reduction <add>, %99, %cst_32 [1] : vector<8x8xf32> to vector<8xf32>
    %101 = vector.shape_cast %100 : vector<8xf32> to vector<8x1xf32>
    %102 = tpu.reciprocal %101 : vector<8x1xf32> -> vector<8x1xf32>
    %103 = vector.broadcast %102 : vector<8x1xf32> to vector<8x8xf32>
    %104 = arith.mulf %99, %103 : vector<8x8xf32>
    %cst_33 = arith.constant dense<0.000000e+00> : vector<8x8xf32>
    %105 = tpu.matmul %104, %93, %cst_33 {dimension_numbers = #tpu.dot_dimension_numbers<[1], [0], [0], [1], [0, 0, 1, 1], [], []>} : vector<8x8xf32>, vector<8x8xf32>, vector<8x8xf32> -> vector<8x8xf32>
    %106 = vector.extract_strided_slice %3 {offsets = [0, 48], sizes = [8, 8], strides = [1, 1]} : vector<8x192xf32> to vector<8x8xf32>
    %cst_34 = arith.constant 0.353553385 : f32
    %107 = vector.broadcast %cst_34 : f32 to vector<8x8xf32>
    %108 = arith.mulf %106, %107 : vector<8x8xf32>
    %109 = vector.extract_strided_slice %3 {offsets = [0, 112], sizes = [8, 8], strides = [1, 1]} : vector<8x192xf32> to vector<8x8xf32>
    %110 = vector.extract_strided_slice %3 {offsets = [0, 176], sizes = [8, 8], strides = [1, 1]} : vector<8x192xf32> to vector<8x8xf32>
    %cst_35 = arith.constant dense<0.000000e+00> : vector<8x8xf32>
    %111 = tpu.matmul %108, %109, %cst_35 {dimension_numbers = #tpu.dot_dimension_numbers<[1], [1], [0], [0], [0, 0, 1, 0], [], []>} : vector<8x8xf32>, vector<8x8xf32>, vector<8x8xf32> -> vector<8x8xf32>
    %cst_36 = arith.constant dense<0xFF800000> : vector<8xf32>
    %112 = vector.multi_reduction <maximumf>, %111, %cst_36 [1] : vector<8x8xf32> to vector<8xf32>
    %113 = vector.shape_cast %112 : vector<8xf32> to vector<8x1xf32>
    %114 = vector.broadcast %113 : vector<8x1xf32> to vector<8x8xf32>
    %115 = arith.subf %111, %114 : vector<8x8xf32>
    %116 = math.exp %115 : vector<8x8xf32>
    %cst_37 = arith.constant dense<0.000000e+00> : vector<8xf32>
    %117 = vector.multi_reduction <add>, %116, %cst_37 [1] : vector<8x8xf32> to vector<8xf32>
    %118 = vector.shape_cast %117 : vector<8xf32> to vector<8x1xf32>
    %119 = tpu.reciprocal %118 : vector<8x1xf32> -> vector<8x1xf32>
    %120 = vector.broadcast %119 : vector<8x1xf32> to vector<8x8xf32>
    %121 = arith.mulf %116, %120 : vector<8x8xf32>
    %cst_38 = arith.constant dense<0.000000e+00> : vector<8x8xf32>
    %122 = tpu.matmul %121, %110, %cst_38 {dimension_numbers = #tpu.dot_dimension_numbers<[1], [0], [0], [1], [0, 0, 1, 1], [], []>} : vector<8x8xf32>, vector<8x8xf32>, vector<8x8xf32> -> vector<8x8xf32>
    %123 = vector.extract_strided_slice %3 {offsets = [0, 56], sizes = [8, 8], strides = [1, 1]} : vector<8x192xf32> to vector<8x8xf32>
    %cst_39 = arith.constant 0.353553385 : f32
    %124 = vector.broadcast %cst_39 : f32 to vector<8x8xf32>
    %125 = arith.mulf %123, %124 : vector<8x8xf32>
    %126 = vector.extract_strided_slice %3 {offsets = [0, 120], sizes = [8, 8], strides = [1, 1]} : vector<8x192xf32> to vector<8x8xf32>
    %127 = vector.extract_strided_slice %3 {offsets = [0, 184], sizes = [8, 8], strides = [1, 1]} : vector<8x192xf32> to vector<8x8xf32>
    %cst_40 = arith.constant dense<0.000000e+00> : vector<8x8xf32>
    %128 = tpu.matmul %125, %126, %cst_40 {dimension_numbers = #tpu.dot_dimension_numbers<[1], [1], [0], [0], [0, 0, 1, 0], [], []>} : vector<8x8xf32>, vector<8x8xf32>, vector<8x8xf32> -> vector<8x8xf32>
    %cst_41 = arith.constant dense<0xFF800000> : vector<8xf32>
    %129 = vector.multi_reduction <maximumf>, %128, %cst_41 [1] : vector<8x8xf32> to vector<8xf32>
    %130 = vector.shape_cast %129 : vector<8xf32> to vector<8x1xf32>
    %131 = vector.broadcast %130 : vector<8x1xf32> to vector<8x8xf32>
    %132 = arith.subf %128, %131 : vector<8x8xf32>
    %133 = math.exp %132 : vector<8x8xf32>
    %cst_42 = arith.constant dense<0.000000e+00> : vector<8xf32>
    %134 = vector.multi_reduction <add>, %133, %cst_42 [1] : vector<8x8xf32> to vector<8xf32>
    %135 = vector.shape_cast %134 : vector<8xf32> to vector<8x1xf32>
    %136 = tpu.reciprocal %135 : vector<8x1xf32> -> vector<8x1xf32>
    %137 = vector.broadcast %136 : vector<8x1xf32> to vector<8x8xf32>
    %138 = arith.mulf %133, %137 : vector<8x8xf32>
    %cst_43 = arith.constant dense<0.000000e+00> : vector<8x8xf32>
    %139 = tpu.matmul %138, %127, %cst_43 {dimension_numbers = #tpu.dot_dimension_numbers<[1], [0], [0], [1], [0, 0, 1, 1], [], []>} : vector<8x8xf32>, vector<8x8xf32>, vector<8x8xf32> -> vector<8x8xf32>
    %140 = tpu.concatenate %20, %37, %54, %71, %88, %105, %122, %139 in 1 : vector<8x8xf32>, vector<8x8xf32>, vector<8x8xf32>, vector<8x8xf32>, vector<8x8xf32>, vector<8x8xf32>, vector<8x8xf32>, vector<8x8xf32> -> vector<8x64xf32>
    %c0_44 = arith.constant 0 : index
    %c0_45 = arith.constant 0 : index
    %141 = vector.load %arg3[%c0_44, %c0_45] : memref<64x64xf32, #tpu.memory_space<vmem>>, vector<64x64xf32>
    %cst_46 = arith.constant dense<0.000000e+00> : vector<8x64xf32>
    %142 = tpu.matmul %140, %141, %cst_46 {dimension_numbers = #tpu.dot_dimension_numbers<[1], [0], [0], [1], [0, 0, 1, 1], [], []>} : vector<8x64xf32>, vector<64x64xf32>, vector<8x64xf32> -> vector<8x64xf32>
    %c0_47 = arith.constant 0 : index
    %c0_48 = arith.constant 0 : index
    %143 = vector.load %arg4[%c0_47, %c0_48] : memref<1x64xf32, #tpu.memory_space<vmem>>, vector<1x64xf32>
    %144 = vector.broadcast %143 : vector<1x64xf32> to vector<8x64xf32>
    %145 = arith.addf %142, %144 : vector<8x64xf32>
    %c0_49 = arith.constant 0 : index
    %c0_50 = arith.constant 0 : index
    %c0_51 = arith.constant 0 : index
    %146 = vector.load %arg5[%c0_49, %c0_50, %c0_51] : memref<1x8x64xf32, #tpu.memory_space<vmem>>, vector<1x8x64xf32>
    %147 = vector.shape_cast %146 : vector<1x8x64xf32> to vector<8x64xf32>
    %148 = vector.shape_cast %145 : vector<8x64xf32> to vector<1x8x64xf32>
    tpu.vector_store %arg5[%c0_49, %c0_50, %c0_51], %148 {strides = array<i32>} : memref<1x8x64xf32, #tpu.memory_space<vmem>>, vector<1x8x64xf32>,
    return
  }
  func.func @transform_0(%arg0: i32) -> (i32, i32, i32) {
    %c0_i32 = arith.constant 0 : i32
    %c0_i32_0 = arith.constant 0 : i32
    %c0_i32_1 = arith.constant 0 : i32
    return %arg0, %c0_i32, %c0_i32_0 : i32, i32, i32
  }
  func.func @transform_1(%arg0: i32) -> (i32, i32) {
    %c0_i32 = arith.constant 0 : i32
    %c0_i32_0 = arith.constant 0 : i32
    %c0_i32_1 = arith.constant 0 : i32
    return %c0_i32, %c0_i32_0 : i32, i32
  }
  func.func @transform_2(%arg0: i32) -> (i32, i32) {
    %c0_i32 = arith.constant 0 : i32
    %c0_i32_0 = arith.constant 0 : i32
    %c0_i32_1 = arith.constant 0 : i32
    return %c0_i32, %c0_i32_0 : i32, i32
  }
  func.func @transform_3(%arg0: i32) -> (i32, i32) {
    %c0_i32 = arith.constant 0 : i32
    %c0_i32_0 = arith.constant 0 : i32
    %c0_i32_1 = arith.constant 0 : i32
    return %c0_i32, %c0_i32_0 : i32, i32
  }
  func.func @transform_4(%arg0: i32) -> (i32, i32, i32) {
    %c0_i32 = arith.constant 0 : i32
    %c0_i32_0 = arith.constant 0 : i32
    %c0_i32_1 = arith.constant 0 : i32
    return %arg0, %c0_i32, %c0_i32_0 : i32, i32, i32
  }
}

</mosaic_0001>

<bundles_post_ra>
// kernel: tpu_custom_call.1
= control target key start
LH: loop header
LB: loop body
LE: loop exit
PB: predicated region body
PF: predicated region fallthrough
CT: control target
= control target key end

     0   :  { %9 = vsyncpa [#allocation3], 0  ;;  %s2739_s0 = inlined_call_operand.hbm [shape: f32[2,8,64], index: 0, kind: input, shape index: {}]   ;;  %s2740_s1 = inlined_call_operand.hbm [shape: f32[64,192], index: 1, kind: input, shape index: {}]   ;;  %s2741_s2 = inlined_call_operand.hbm [shape: f32[64,64], index: 2, kind: input, shape index: {}]   ;;  %s2742_s3 = inlined_call_operand.vmem [shape: f32[1,64], index: 3, kind: input, shape index: {}]   ;;  %s2743_s4 = inlined_call_operand.hbm [shape: f32[2,8,64], index: 4, kind: output, shape index: {}]  }
   0x1   :  { %11 = vsyncpa [#allocation3 + $0x1], 0 }
   0x2   :  { %12 = vsyncpa [#allocation6], 0 }
   0x3   :  { %13 = vsyncpa [#allocation4], 0 }
   0x4   :  { %15 = vsyncpa [#allocation4 + $0x1], 0  ;;  %s2390_s15 = smov 0   ;;  %s2392_s16 = smov 0  }
   0x5   :  { %s2394_s17 = smov 0   ;;  %s2396_s18 = smov 0  }
   0x6 LB: > { %s2411_s19 = sadd.s32 4294967295, %s2338_s18   ;;  %s1887_s20 = sadd.s32 4294967294, %s2338_s18   ;;  %s2338_s18 = sphi %s2396_s18, %s2765_s18   ;;  %s2334_s17 = sphi %s2394_s17, %s2764_s17   ;;  %s2330_s16 = sphi %s2392_s16, %s2763_s16   ;;  %s2326_s15 = sphi %s2390_s15, %s2762_s15  }
   0x7   : > { %p41_p0 = scmp.ne.s32.totalorder %s2330_s16, %s2326_s15  ;;  %p2744_p1 = scmp.eq.s32.totalorder %s2411_s19, 0 }
   0x8   : > { %p134_p3 = scmp.eq.s32.totalorder %s1887_s20, 1  ;;  %p1888_p5 = scmp.ge.s32.totalorder %s2338_s18, 1 }
   0x9   : > { %p2420_p4 = por %p2744_p1, %p41_p0  ;;  %p141_p7 = scmp.lt.s32.totalorder %s2338_s18, 3 }
   0xa   : > { %p2425_p6 = por %p134_p3, %p41_p0  ;;  %s2340_s24 = smov [#allocation5]  }
   0xb   : > { %s2748_s21 = scalar_select %p2420_p4, 1, 0 }
   0xc   : > { %s2749_s22 = scalar_select %p2425_p6, 1, 0 }
   0xd   : > { %p2430_p8 = pnand %p1888_p5, %p141_p7  ;;  %s153_s25 = sshll.u32 %s2340_s24, 4  ;;  %s154_s25 = int_to_ptr.vmem [resolvable:$true] %s153_s25 }
   0xe   : > { %s2341_s27 = smov [#allocation7]   ;;  %s2201_s29 = scalar_lea.vmem %s154_s25, 2048 }
   0xf   : > { %s2750_s23 = scalar_select %p2430_p8, 1, 0 }
  0x10   : > { %p2082_p9 = pneg %p2430_p8  ;;  %s166_s28 = sshll.u32 %s2341_s27, 4  ;;  %s167_s28 = int_to_ptr.vmem [resolvable:$true] %s166_s28 }
  0x11   : > { %p2202_p13 = scmp.ne.s32.totalorder %s154_s25, %s2201_s29  ;;  %p2209_p5 = scmp.lt.s32.totalorder %s154_s25, %s154_s25 }
  0x12   : > { %p2439_p11 = pnand %p2082_p9, %p2744_p1  ;;  %p2210_p7 = scmp.lt.s32.totalorder %s2201_s29, %s2201_s29 }
  0x14   : > { %p2192_p12 = pneg %p2439_p11  ;;  %p2211_p10 = por %p2210_p7, %p2209_p5 }
  0x16   : > { %p2204_p0 = pnand %p2202_p13, %p2192_p12 }
  0x18   : > { %p2205_p3 = pneg %p2204_p0 }
  0x1a   : > { %p2212_p9 = pnand %p2211_p10, %p2205_p3 }
  0x1c   : > { %2215 = shalt.err (!%p2212_p9)
}
  0x1d   : > { %s2342_s30 = smov 256   ;;  %s2343_s5 = smov 16  }
  0x1e   : > { %2085 = dma.hbm_to_vmem [thread:$0]  (!%p2439_p11), %s2740_s1, 2048, %s154_s25, [#allocation6], %s2342_s30, %s2342_s30, %s2343_s5  }
  0x1f   : > { %s2227_s8 = scalar_lea.vmem %s167_s28, 1024  ;;  %p2235_p2 = scmp.lt.s32.totalorder %s167_s28, %s167_s28 }
  0x20   : > { %p2228_p1 = scmp.ne.s32.totalorder %s167_s28, %s2227_s8  ;;  %p2236_p6 = scmp.lt.s32.totalorder %s2227_s8, %s2227_s8 }
  0x22   : > { %p2230_p13 = pnand %p2228_p1, %p2192_p12  ;;  %p2237_p5 = por %p2236_p6, %p2235_p2 }
  0x24   : > { %p2231_p0 = pneg %p2230_p13 }
  0x26   : > { %p2238_p10 = pnand %p2237_p5, %p2231_p0 }
  0x28   : > { %2241 = shalt.err (!%p2238_p10)
}
  0x29   : > { %s2344_s9 = smov 128   ;;  %s2345_s10 = smov 8  }
  0x2a   : > { %2088 = dma.hbm_to_vmem [thread:$0]  (!%p2439_p11), %s2741_s2, 1024, %s167_s28, [#allocation6], %s2344_s9, %s2344_s9, %s2345_s10  }
  0x2b   : > { %s2462_s13 = sadd.s32 1, %s2338_s18   ;;  %s28_s20 = sadd.s32 1, %s2334_s17 }
  0x2c   : > { %s25_s14 = ssub.s32 %s2338_s18, %s2462_s13  ;;  %p35_p2 = scmp.ne.s32.totalorder %s2334_s17, %s2330_s16 }
  0x2d   : > { %p26_p1 = scmp.eq.s32.totalorder %s25_s14, 0  ;;  %p36_p6 = scmp.eq.s32.totalorder %s2338_s18, 0 }
  0x2e   : > { %p2752_p3 = scmp.eq.s32.totalorder %s2411_s19, 1  ;;  %p2099_p9 = scmp.lt.s32.totalorder %s2338_s18, 2 }
  0x2f   : > { %s2471_s24 = scalar_select %p26_p1, %s2334_s17, %s28_s20  }
  0x30   : > { %p37_p12 = por %p36_p6, %p35_p2  ;;  %p2475_p7 = por %p2752_p3, %p35_p2 }
  0x31   : > { %s183_s26 = sand.u32 1, %s2334_s17   ;;  %s1893_s28 = sshll.u32 %s2338_s18, 7 }
  0x32   : > { %s2753_s25 = scalar_select %p2475_p7, 1, 0 }
  0x33   : > { %s1892_s27 = sshll.u32 %s183_s26, 3  ;;  %s2485_s5 = scalar_lea.hbm %s2739_s0, %s1893_s28 }
  0x34   : > { %s187_s6 = scalar_lea.vmem [#allocation2], %s1892_s27  ;;  %p2487_p11 = pnand %p2099_p9, %p37_p12 }
  0x35   : > { %s194_s7 = sshll.u32 %s187_s6, 4  ;;  %s184_s9 = scalar_lea.sflag [#allocation3], %s183_s26  ;;  %s195_s7 = int_to_ptr.vmem [resolvable:$true] %s194_s7 }
  0x36   : > { %s2242_s10 = scalar_lea.hbm %s2485_s5, 128  ;;  %p2244_p0 = pneg %p2487_p11 }
  0x37   : > { %p2243_p13 = scmp.ne.s32.totalorder %s2485_s5, %s2242_s10  ;;  %s2247_s14 = scalar_lea.hbm %s2739_s0, 256 }
  0x38   : > { %p2248_p1 = scmp.lt.s32.totalorder %s2485_s5, %s2739_s0  ;;  %p2249_p2 = scmp.lt.s32.totalorder %s2247_s14, %s2242_s10 }
  0x39   : > { %p2245_p5 = pnand %p2244_p0, %p2243_p13 }
  0x3a   : > { %p2250_p6 = por %p2249_p2, %p2248_p1 }
  0x3b   : > { %p2246_p10 = pneg %p2245_p5 }
  0x3d   : > { %p2251_p12 = pnand %p2250_p6, %p2246_p10 }
  0x3f   : > { %2254 = shalt.err (!%p2251_p12)
}
  0x40   : > { %s2255_s28 = scalar_lea.vmem %s195_s7, 128  ;;  %s2346_s26 = smov [#allocation2]  }
  0x41   : > { %p2256_p3 = scmp.ne.s32.totalorder %s195_s7, %s2255_s28  ;;  %s2260_s29 = sshll.u32 %s2346_s26, 4  ;;  %s2261_s29 = int_to_ptr.vmem [resolvable:$false] %s2260_s29 }
  0x42   : > { %s2262_s30 = scalar_lea.vmem %s2261_s29, 256  ;;  %p2263_p13 = scmp.lt.s32.totalorder %s195_s7, %s2261_s29 }
  0x43   : > { %p2258_p9 = pnand %p2256_p3, %p2244_p0  ;;  %p2264_p5 = scmp.lt.s32.totalorder %s2262_s30, %s2255_s28 }
  0x45   : > { %p2259_p7 = pneg %p2258_p9  ;;  %p2265_p4 = por %p2264_p5, %p2263_p13 }
  0x47   : > { %p2266_p8 = pnand %p2265_p4, %p2259_p7 }
  0x49   : > { %2269 = shalt.err (!%p2266_p8)
}
  0x4a   : > { %2092 = dma.hbm_to_vmem [thread:$0]  (!%p2487_p11), %s2485_s5, 128, %s195_s7, %s184_s9  }
  0x4b   : > { %p2755_p10 = scmp.ne.s32.totalorder %s2750_s23, 0 }
  0x4c   : > { %s2508_s6 = sand.u32 (!%p2755_p10), 1, %s2330_s16   ;;  %p2756_p4 = scmp.ne.s32.totalorder (!%p2755_p10), %s2748_s21, 0 }
  0x4d   : > { %203 = sbr.rel (%p2755_p10) target bundleno = 2992 (0xbb0), region = 36  ;;  %s1895_s10 = sshll.u32 (!%p2755_p10), %s2508_s6, 3 }
  0x4e   : > { %s206_s11 = scalar_lea.sflag (!%p2755_p10), [#allocation3], %s2508_s6  ;;  %s2514_s12 = scalar_lea.vmem (!%p2755_p10), [#allocation2], %s1895_s10 }
  0x52   : > { %2313 = dma.done.wait (%p2756_p4), %s206_s11, 128  }
  0x53   : > { %2315 = vsyncadd (%p2756_p4), %s206_s11, 4294967168  ;;  %p2757_p8 = scmp.eq.s32.totalorder %s2411_s19, 0 }
  0x55   : > { %2317 = dma.done.wait (%p2757_p8), [#allocation6], 3072   ;;  %p2758_p7 = pmov %p2757_p8 }
  0x56   : > { %v2347_v0 = vmov 0.0   ;;  %v258_v1 = vld [vmem:[#allocation5 + $0x78] sm:$0xff]  ;;  %v257_v2 = vld [vmem:[#allocation5 + $0x70] sm:$0xff]  ;;  %v256_v3 = vld [vmem:[#allocation5 + $0x68] sm:$0xff]  ;;  %vm259_vm0 = vcmask 523264   ;;  %vm2348_vm1 = vmmov 0  }
  0x57   : > { %2319 = vsyncadd (%p2758_p7), [#allocation6], 4294964224  ;;  %327 = vmatprep.mubr.f32.mxu0 %v2347_v0  ;;  %1971 = vmatprep.subr.mxu1 %v2347_v0  ;;  %v255_v4 = vld [vmem:[#allocation5 + $0x60] sm:$0xff]  ;;  %v254_v5 = vld [vmem:[#allocation5 + $0x58] sm:$0xff]  ;;  %s2349_s21 = smov 56   ;;  %s2350_s23 = smov 64  }
  0x58   : > { %279 = vmatprep.subr.mxu0 %v258_v1  ;;  %v253_v6 = vld [vmem:[#allocation5 + $0x50] sm:$0xff]  ;;  %v252_v7 = vld [vmem:[#allocation5 + $0x48] sm:$0xff]  ;;  %v251_v8 = vld [vmem:[#allocation5 + $0x40] sm:$0xff]  ;;  %1973 = vmatprep.mubr.msk.f32.mxu1 %vm2348_vm1, %v2347_v0  ;;  %vm338_vm2 = vcmask 64512   ;;  %s2351_s5 = smov 120   ;;  %s2352_s7 = smov 112  }
  0x59   : > { %280 = vmatpush1.msra.mxu0 %v257_v2  ;;  %v250_v9 = vld [vmem:[#allocation5 + $0x38] sm:$0xff]  ;;  %v249_v10 = vld [vmem:[#allocation5 + $0x30] sm:$0xff]  ;;  %v248_v11 = vld [vmem:[#allocation5 + $0x28] sm:$0xff]  ;;  %s2353_s8 = smov 48   ;;  %s2354_s9 = smov 104   ;;  %vm1683_vm3 = vcmask 130048  }
  0x5a   : > { %281 = vmatprep.subr.mxu0 %v256_v3  ;;  %v247_v12 = vld [vmem:[#allocation5 + $0x20] sm:$0xff]  ;;  %v246_v13 = vld [vmem:[#allocation5 + $0x18] sm:$0xff]  ;;  %v245_v14 = vld [vmem:[#allocation5 + $0x10] sm:$0xff]  ;;  %s2355_s14 = smov 32   ;;  %s2356_s20 = smov 96   ;;  %vm1685_vm4 = vcmask 195584  }
  0x5b   : > { %282 = vmatpush1.msra.mxu0 %v255_v4  ;;  %v244_v15 = vld [vmem:[#allocation5 + $0x8] sm:$0xff]  ;;  %v243_v16 = vld [vmem:[#allocation5] sm:$0xff]  ;;  %v242_v17 = vld [vmem:[%s2514_s12] sm:$0xff]  ;;  %s2357_s27 = smov 24   ;;  %s2358_s28 = smov 16   ;;  %vm1687_vm5 = vcmask 261120  }
  0x5c   : > { %283 = vmatprep.subr.mxu0 %v254_v5  ;;  %s2359_s26 = smov 8   ;;  %s2360_s29 = smov 40   ;;  %vm1689_vm6 = vcmask 326656   ;;  %vm1691_vm7 = vcmask 392192   ;;  %vm1693_vm8 = vcmask 457728  }
  0x5d   : > { %284 = vmatpush1.msra.mxu0 %v253_v6  ;;  %s2361_s30 = smov 88   ;;  %s2362_s11 = smov 80  }
  0x5e   : > { %285 = vmatprep.subr.mxu0 %v252_v7  ;;  %s2363_s12 = smov 72   ;;  %p2759_p0 = scmp.ne.s32.totalorder %s2753_s25, 0 }
  0x5f   : > { %286 = vmatpush1.msra.mxu0 %v251_v8 }
  0x60   : > { %287 = vmatprep.subr.mxu0 %v250_v9 }
  0x61   : > { %288 = vmatpush1.msra.mxu0 %v249_v10 }
  0x62   : > { %289 = vmatprep.subr.mxu0 %v248_v11 }
  0x63   : > { %290 = vmatpush1.msra.mxu0 %v247_v12 }
  0x64   : > { %291 = vmatprep.subr.mxu0 %v246_v13 }
  0x65   : > { %292 = vmatpush1.msra.mxu0 %v245_v14 }
  0x66   : > { %293 = vmatprep.subr.mxu0 %v244_v15 }
  0x67   : > { %294 = vmatpush1.msra.mxu0 %v243_v16 }
  0x68   : > { %1899 = vmatmul.mubr.msk.f32.vlgmr.msra.gmra.mxu0 %vm259_vm0, %v242_v17  ;;  %2011 = vmatprep.subr.mxu0 %v2347_v0 }
  0x69   : > { %2013 = vmatprep.mubr.msk.f32.mxu0 %vm2348_vm1, %v2347_v0 }
 0x128   : > { %v2533_v18 = vpop.f32.mrf.mxu0 }
 0x129   : > { %500 = vrot.lane.b32.xlu1 %v2533_v18, %s2349_s21  ;;  %336 = vrot.lane.b32.xlu0 %v2533_v18, %s2350_s23  ;;  %v2540_v20 = vmul.f32 0.35355338, %v2533_v18 }
 0x12a   : > { %v2543_v21 = vpop.f32.mrf.mxu0 }
 0x19b   : > { %v337_v19 = vpop.permute.xlu0 %336  ;;  %v501_v30 = vpop.permute.xlu1 %500 }
 0x19c   : > { %1972 = vmatpush3.xpose.msk.msra.mxu1 %vm338_vm2, %v337_v19 }
 0x19d   : > { %1976 = vmatprep.subr.mxu1 %v2347_v0 }
 0x19f   : > { %1974 = vmatmul.mubr.msk.f32.vlgmr.msra.gmra.mxu1 %vm338_vm2, %v2540_v20 }
 0x1a0   : > { %1977 = vmatpush3.msra.mxu1 %v2543_v21  ;;  %1978 = vmatprep.mubr.msk.f32.mxu1 %vm2348_vm1, %v2347_v0 }
 0x1a1   : > { %1981 = vmatprep.subr.mxu1 %v2347_v0 }
 0x25f   : > { %v410_v22 = vpop.f32.mrf.mxu1 }
 0x260   : > { %v414_v23 = vsel %vm338_vm2, %v410_v22, -inf }
 0x261   : > { %415 = vmax.xlane.f32.xlu0 %v414_v23  ;;  %v1975_v24 = vpop.f32.mrf.mxu1 }
 0x277   : > { %588 = vrot.lane.b32.xlu0 %v2543_v21, %s2351_s5 }
 0x2ea   : > { %v416_v25 = vpop.xlane.xlu0 %415 }
 0x2eb   : > { %v417_v26 = vsub.f32 %v410_v22, %v416_v25 }
 0x2ed   : > { %v418_v27 = vmul.f32 1.442695, %v417_v26 }
 0x2ee   : > { %v589_v35 = vpop.permute.xlu0 %588 }
 0x2ef   : > { %2158 = vpow2.f32 %v418_v27 }
 0x2fc   : > { %v2159_v28 = vpop.eup %2158 }
 0x2fd   : > { %v420_v29 = vsel %vm338_vm2, %v2159_v28, 0.0 }
 0x2fe   : > { %421 = vadd.xlane.f32.xlu1 %v420_v29 }
 0x30f   : > { %498 = vrot.lane.b32.xlu1 %v2540_v20, %s2351_s5  ;;  %s1927_s5 = sshll.u32 %s2411_s19, 7  ;;  %s2364_s19 = smov [#allocation8]  }
 0x387   : > { %v422_v31 = vpop.xlane.xlu1 %421 }
 0x388   : > { %2160 = vrcp.f32 %v422_v31 }
 0x38b   : > { %v499_v34 = vpop.permute.xlu1 %498 }
 0x395   : > { %v2161_v32 = vpop.eup %2160 }
 0x396   : > { %v424_v33 = vmul.f32 %v2161_v32, %v2159_v28 }
 0x398   : > { %1979 = vmatmul.mubr.msk.f32.vlgmr.msra.gmra.mxu1 %vm338_vm2, %v424_v33 }
 0x399   : > { %1982 = vmatpush3.xpose.msk.msra.mxu1 %vm338_vm2, %v501_v30  ;;  %1983 = vmatprep.mubr.msk.f32.mxu1 %vm2348_vm1, %v2347_v0 }
 0x39a   : > { %1986 = vmatprep.subr.mxu1 %v2347_v0 }
 0x39c   : > { %1984 = vmatmul.mubr.msk.f32.vlgmr.msra.gmra.mxu1 %vm338_vm2, %v499_v34 }
 0x39d   : > { %1987 = vmatpush3.msra.mxu1 %v589_v35  ;;  %1988 = vmatprep.mubr.msk.f32.mxu1 %vm2348_vm1, %v2347_v0 }
 0x39e   : > { %1991 = vmatprep.subr.mxu1 %v2347_v0 }
 0x458   : > { %v2564_v36 = vpop.f32.mrf.mxu1 }
 0x45a   : > { %v1980_v37 = vpop.f32.mrf.mxu1 }
 0x45c   : > { %v572_v38 = vpop.f32.mrf.mxu1 }
 0x45d   : > { %v576_v39 = vsel %vm338_vm2, %v572_v38, -inf }
 0x45e   : > { %577 = vmax.xlane.f32.xlu1 %v576_v39  ;;  %v1985_v40 = vpop.f32.mrf.mxu1 }
 0x46f   : > { %664 = vrot.lane.b32.xlu1 %v2540_v20, %s2352_s7 }
 0x4e7   : > { %v578_v41 = vpop.xlane.xlu1 %577 }
 0x4e8   : > { %v579_v42 = vsub.f32 %v572_v38, %v578_v41 }
 0x4ea   : > { %v580_v43 = vmul.f32 1.442695, %v579_v42 }
 0x4eb   : > { %v665_v50 = vpop.permute.xlu1 %664 }
 0x4ec   : > { %2162 = vpow2.f32 %v580_v43 }
 0x4f9   : > { %v2163_v44 = vpop.eup %2162 }
 0x4fa   : > { %v582_v45 = vsel %vm338_vm2, %v2163_v44, 0.0 }
 0x4fb   : > { %583 = vadd.xlane.f32.xlu0 %v582_v45 }
 0x511   : > { %666 = vrot.lane.b32.xlu0 %v2533_v18, %s2353_s8 }
 0x584   : > { %v584_v46 = vpop.xlane.xlu0 %583 }
 0x585   : > { %2164 = vrcp.f32 %v584_v46 }
 0x588   : > { %v667_v49 = vpop.permute.xlu0 %666 }
 0x592   : > { %v2165_v47 = vpop.eup %2164 }
 0x593   : > { %v586_v48 = vmul.f32 %v2165_v47, %v2163_v44 }
 0x595   : > { %1989 = vmatmul.mubr.msk.f32.vlgmr.msra.gmra.mxu1 %vm338_vm2, %v586_v48 }
 0x596   : > { %1992 = vmatpush3.xpose.msk.msra.mxu1 %vm338_vm2, %v667_v49  ;;  %1993 = vmatprep.mubr.msk.f32.mxu1 %vm2348_vm1, %v2347_v0 }
 0x597   : > { %1996 = vmatprep.subr.mxu1 %v2347_v0 }
 0x599   : > { %1994 = vmatmul.mubr.msk.f32.vlgmr.msra.gmra.mxu1 %vm338_vm2, %v665_v50 }
 0x59a   : > { %1998 = vmatprep.mubr.msk.f32.mxu1 %vm2348_vm1, %v2347_v0 }
 0x655   : > { %v2579_v51 = vpop.f32.mrf.mxu1 }
 0x657   : > { %v1990_v52 = vpop.f32.mrf.mxu1 }
 0x659   : > { %v738_v53 = vpop.f32.mrf.mxu1 }
 0x65a   : > { %v742_v54 = vsel %vm338_vm2, %v738_v53, -inf }
 0x65b   : > { %743 = vmax.xlane.f32.xlu0 %v742_v54  ;;  %v1995_v55 = vpop.f32.mrf.mxu1 }
 0x671   : > { %753 = vrot.lane.b32.xlu0 %v2543_v21, %s2352_s7  ;;  %s241_s7 = scalar_lea.vmem [#allocation8], %s1895_s10  ;;  %s2274_s10 = sshll.u32 %s2364_s19, 4  ;;  %s2275_s10 = int_to_ptr.vmem [resolvable:$false] %s2274_s10 }
 0x675   : > { %829 = vrot.lane.b32.xlu0 %v2540_v20, %s2354_s9 }
 0x679   : > { %996 = vrot.lane.b32.xlu0 %v2533_v18, %s2355_s14 }
 0x67d   : > { %994 = vrot.lane.b32.xlu0 %v2540_v20, %s2356_s20 }
 0x681   : > { %1161 = vrot.lane.b32.xlu0 %v2533_v18, %s2357_s27 }
 0x685   : > { %1326 = vrot.lane.b32.xlu0 %v2533_v18, %s2358_s28 }
 0x689   : > { %1491 = vrot.lane.b32.xlu0 %v2533_v18, %s2359_s26 }
 0x6e4   : > { %v744_v56 = vpop.xlane.xlu0 %743 }
 0x6e5   : > { %v745_v57 = vsub.f32 %v738_v53, %v744_v56 }
 0x6e7   : > { %v746_v58 = vmul.f32 1.442695, %v745_v57 }
 0x6e8   : > { %v754_v59 = vpop.permute.xlu0 %753 }
 0x6e9   : > { %2166 = vpow2.f32 %v746_v58  ;;  %1997 = vmatpush3.msra.mxu1 %v754_v59 }
 0x6ea   : > { %2001 = vmatprep.subr.mxu1 %v2347_v0 }
 0x6ec   : > { %v830_v60 = vpop.permute.xlu0 %829 }
 0x6f0   : > { %v997_v61 = vpop.permute.xlu0 %996 }
 0x6f1   : > { %2012 = vmatpush3.xpose.msk.msra.mxu0 %vm338_vm2, %v997_v61 }
 0x6f2   : > { %2021 = vmatprep.subr.mxu0 %v2347_v0 }
 0x6f4   : > { %v995_v62 = vpop.permute.xlu0 %994 }
 0x6f5   : > { %2014 = vmatmul.mubr.msk.f32.vlgmr.msra.gmra.mxu0 %vm338_vm2, %v995_v62 }
 0x6f6   : > { %v2167_v63 = vpop.eup %2166  ;;  %2023 = vmatprep.mubr.msk.f32.mxu0 %vm2348_vm1, %v2347_v0 }
 0x6f7   : > { %v748_v1 = vsel %vm338_vm2, %v2167_v63, 0.0 }
 0x6f8   : > { %749 = vadd.xlane.f32.xlu1 %v748_v1  ;;  %v1162_v2 = vpop.permute.xlu0 %1161 }
 0x6f9   : > { %2022 = vmatpush3.xpose.msk.msra.mxu0 %vm338_vm2, %v1162_v2 }
 0x6fa   : > { %2031 = vmatprep.subr.mxu0 %v2347_v0 }
 0x6fc   : > { %v1327_v5 = vpop.permute.xlu0 %1326 }
 0x700   : > { %v1492_v8 = vpop.permute.xlu0 %1491 }
 0x709   : > { %831 = vrot.lane.b32.xlu1 %v2533_v18, %s2360_s29 }
 0x70d   : > { %1159 = vrot.lane.b32.xlu1 %v2540_v20, %s2361_s30 }
 0x711   : > { %1324 = vrot.lane.b32.xlu1 %v2540_v20, %s2362_s11 }
 0x715   : > { %1489 = vrot.lane.b32.xlu1 %v2540_v20, %s2363_s12 }
 0x781   : > { %v750_v3 = vpop.xlane.xlu1 %749 }
 0x782   : > { %2168 = vrcp.f32 %v750_v3 }
 0x785   : > { %v832_v4 = vpop.permute.xlu1 %831 }
 0x789   : > { %v1160_v6 = vpop.permute.xlu1 %1159 }
 0x78a   : > { %2024 = vmatmul.mubr.msk.f32.vlgmr.msra.gmra.mxu0 %vm338_vm2, %v1160_v6 }
 0x78b   : > { %2032 = vmatpush3.xpose.msk.msra.mxu0 %vm338_vm2, %v1327_v5  ;;  %2033 = vmatprep.mubr.msk.f32.mxu0 %vm2348_vm1, %v2347_v0 }
 0x78c   : > { %2041 = vmatprep.subr.mxu0 %v2347_v0 }
 0x78d   : > { %v1325_v7 = vpop.permute.xlu1 %1324 }
 0x78e   : > { %2034 = vmatmul.mubr.msk.f32.vlgmr.msra.gmra.mxu0 %vm338_vm2, %v1325_v7 }
 0x78f   : > { %v2169_v9 = vpop.eup %2168  ;;  %2042 = vmatpush3.xpose.msk.msra.mxu0 %vm338_vm2, %v1492_v8  ;;  %2043 = vmatprep.mubr.msk.f32.mxu0 %vm2348_vm1, %v2347_v0 }
 0x790   : > { %v752_v10 = vmul.f32 %v2169_v9, %v2167_v63  ;;  %2051 = vmatprep.subr.mxu0 %v2347_v0 }
 0x791   : > { %v1490_v11 = vpop.permute.xlu1 %1489 }
 0x792   : > { %1999 = vmatmul.mubr.msk.f32.vlgmr.msra.gmra.mxu1 %vm338_vm2, %v752_v10  ;;  %2044 = vmatmul.mubr.msk.f32.vlgmr.msra.gmra.mxu0 %vm338_vm2, %v1490_v11 }
 0x793   : > { %2002 = vmatpush3.xpose.msk.msra.mxu1 %vm338_vm2, %v832_v4  ;;  %2003 = vmatprep.mubr.msk.f32.mxu1 %vm2348_vm1, %v2347_v0 }
 0x794   : > { %2006 = vmatprep.subr.mxu1 %v2347_v0  ;;  %2067 = vmatprep.mubr.msk.f32.mxu0 %vm2348_vm1, %v2347_v0 }
 0x796   : > { %2004 = vmatmul.mubr.msk.f32.vlgmr.msra.gmra.mxu1 %vm338_vm2, %v830_v60 }
 0x797   : > { %2008 = vmatprep.mubr.msk.f32.mxu1 %vm2348_vm1, %v2347_v0 }
 0x7b5   : > { %v1068_v12 = vpop.f32.mrf.mxu0 }
 0x7b6   : > { %v1072_v13 = vsel %vm338_vm2, %v1068_v12, -inf }
 0x7b7   : > { %1073 = vmax.xlane.f32.xlu1 %v1072_v13  ;;  %v2015_v14 = vpop.f32.mrf.mxu0  ;;  %v1701_v13 = vld [vmem:[#allocation7 + $0x30] sm:$0xff] }
 0x7b8   : > { %v1700_v14 = vld [vmem:[#allocation7 + $0x28] sm:$0xff] }
 0x840   : > { %v1074_v15 = vpop.xlane.xlu1 %1073 }
 0x841   : > { %v1075_v16 = vsub.f32 %v1068_v12, %v1074_v15  ;;  %v1702_v12 = vld [vmem:[#allocation7 + $0x38] sm:$0xff]  ;;  %v1699_v15 = vld [vmem:[#allocation7 + $0x20] sm:$0xff] }
 0x842   : > { %2052 = vmatpush3.msra.mxu0 %v1702_v12 }
 0x843   : > { %v1076_v17 = vmul.f32 1.442695, %v1075_v16  ;;  %2053 = vmatprep.subr.mxu0 %v2347_v0  ;;  %v1698_v16 = vld [vmem:[#allocation7 + $0x18] sm:$0xff] }
 0x844   : > { %2054 = vmatpush3.msra.mxu0 %v1701_v13 }
 0x845   : > { %2170 = vpow2.f32 %v1076_v17  ;;  %2055 = vmatprep.subr.mxu0 %v2347_v0 }
 0x846   : > { %2056 = vmatpush3.msra.mxu0 %v1700_v14 }
 0x847   : > { %2057 = vmatprep.subr.mxu0 %v2347_v0 }
 0x848   : > { %2058 = vmatpush3.msra.mxu0 %v1699_v15 }
 0x849   : > { %2059 = vmatprep.subr.mxu0 %v2347_v0 }
 0x84a   : > { %v1233_v18 = vpop.f32.mrf.mxu0  ;;  %2060 = vmatpush3.msra.mxu0 %v1698_v16 }
 0x84b   : > { %v1237_v33 = vsel %vm338_vm2, %v1233_v18, -inf  ;;  %2061 = vmatprep.subr.mxu0 %v2347_v0 }
 0x84c   : > { %v2025_v19 = vpop.f32.mrf.mxu0 }
 0x84d   : > { %v1696_v19 = vld [vmem:[#allocation7 + $0x8] sm:$0xff] }
 0x84e   : > { %v1398_v20 = vpop.f32.mrf.mxu0 }
 0x84f   : > { %v1402_v34 = vsel %vm338_vm2, %v1398_v20, -inf }
 0x850   : > { %v2035_v22 = vpop.f32.mrf.mxu0 }
 0x852   : > { %v825_v23 = vpop.f32.mrf.mxu1  ;;  %v1563_v24 = vpop.f32.mrf.mxu0 }
 0x853   : > { %v1567_v25 = vsel %vm338_vm2, %v1563_v24, -inf  ;;  %v2635_v26 = vpop.eup %2170 }
 0x854   : > { %1568 = vmax.xlane.f32.xlu1 %v1567_v25  ;;  %v2000_v27 = vpop.f32.mrf.mxu1  ;;  %v2045_v28 = vpop.f32.mrf.mxu0  ;;  %v1078_v30 = vsel %vm338_vm2, %v2635_v26, 0.0 }
 0x856   : > { %v903_v29 = vpop.f32.mrf.mxu1 }
 0x857   : > { %v907_v31 = vsel %vm338_vm2, %v903_v29, -inf }
 0x858   : > { %1079 = vadd.xlane.f32.xlu1 %v1078_v30  ;;  %908 = vmax.xlane.f32.xlu0 %v907_v31  ;;  %v2005_v32 = vpop.f32.mrf.mxu1 }
 0x85c   : > { %1238 = vmax.xlane.f32.xlu0 %v1237_v33 }
 0x860   : > { %1403 = vmax.xlane.f32.xlu0 %v1402_v34 }
 0x8dd   : > { %v1569_v35 = vpop.xlane.xlu1 %1568 }
 0x8de   : > { %v1570_v38 = vsub.f32 %v1563_v24, %v1569_v35 }
 0x8e0   : > { %v1571_v41 = vmul.f32 1.442695, %v1570_v38 }
 0x8e1   : > { %v909_v37 = vpop.xlane.xlu0 %908  ;;  %v1080_v57 = vpop.xlane.xlu1 %1079 }
 0x8e2   : > { %v910_v42 = vsub.f32 %v903_v29, %v909_v37 }
 0x8e4   : > { %v911_v46 = vmul.f32 1.442695, %v910_v42 }
 0x8e5   : > { %v1239_v39 = vpop.xlane.xlu0 %1238 }
 0x8e6   : > { %v1240_v40 = vsub.f32 %v1233_v18, %v1239_v39  ;;  %v1697_v18 = vld [vmem:[#allocation7 + $0x10] sm:$0xff] }
 0x8e7   : > { %2062 = vmatpush3.msra.mxu0 %v1697_v18 }
 0x8e8   : > { %v1241_v43 = vmul.f32 1.442695, %v1240_v40  ;;  %2063 = vmatprep.subr.mxu0 %v2347_v0 }
 0x8e9   : > { %v1404_v44 = vpop.xlane.xlu0 %1403  ;;  %2064 = vmatpush3.msra.mxu0 %v1696_v19 }
 0x8ea   : > { %2172 = vpow2.f32 %v1241_v43  ;;  %v1405_v45 = vsub.f32 %v1398_v20, %v1404_v44  ;;  %2065 = vmatprep.subr.mxu0 %v2347_v0  ;;  %v1924_v44 = vld [vmem:[%s2742_s3] ss:$0 sm:$0xff] }
 0x8eb   : > { %2174 = vpow2.f32 %v1571_v41 }
 0x8ec   : > { %v1406_v47 = vmul.f32 1.442695, %v1405_v45 }
 0x8ee   : > { %2176 = vpow2.f32 %v1406_v47 }
 0x8ef   : > { %2178 = vpow2.f32 %v911_v46 }
 0x8f7   : > { %v2173_v48 = vpop.eup %2172 }
 0x8f8   : > { %v1243_v49 = vsel %vm338_vm2, %v2173_v48, 0.0  ;;  %v2175_v50 = vpop.eup %2174 }
 0x8f9   : > { %1244 = vadd.xlane.f32.xlu0 %v1243_v49  ;;  %v1573_v53 = vsel %vm338_vm2, %v2175_v50, 0.0 }
 0x8fb   : > { %v2177_v52 = vpop.eup %2176 }
 0x8fc   : > { %v1408_v54 = vsel %vm338_vm2, %v2177_v52, 0.0  ;;  %v2179_v55 = vpop.eup %2178 }
 0x8fd   : > { %1574 = vadd.xlane.f32.xlu0 %v1573_v53  ;;  %1409 = vadd.xlane.f32.xlu1 %v1408_v54  ;;  %v913_v56 = vsel %vm338_vm2, %v2179_v55, 0.0 }
 0x901   : > { %914 = vadd.xlane.f32.xlu0 %v913_v56 }
 0x90e   : > { %918 = vrot.lane.b32.xlu1 %v2543_v21, %s2354_s9 }
 0x912   : > { %1248 = vrot.lane.b32.xlu1 %v2543_v21, %s2361_s30 }
 0x916   : > { %1413 = vrot.lane.b32.xlu1 %v2543_v21, %s2362_s11 }
 0x917   : > { %1083 = vrot.lane.b32.xlu0 %v2543_v21, %s2356_s20  ;;  %s2701_s20 = scalar_lea.hbm %s2743_s4, %s1927_s5 }
 0x91a   : > { %1655 = vrot.lane.b32.xlu1 %v2579_v51, %s2359_s26  ;;  %s2276_s26 = scalar_lea.vmem %s2275_s10, 256 }
 0x91b   : > { %1578 = vrot.lane.b32.xlu0 %v2543_v21, %s2363_s12 }
 0x91f   : > { %1659 = vrot.lane.b32.xlu0 %v825_v23, %s2358_s28  ;;  %v1695_v23 = vld [vmem:[#allocation7] sm:$0xff] }
 0x920   : > { %2066 = vmatpush3.msra.mxu0 %v1695_v23 }
 0x982   : > { %v1245_v58 = vpop.xlane.xlu0 %1244 }
 0x986   : > { %v1410_v59 = vpop.xlane.xlu1 %1409  ;;  %v1575_v60 = vpop.xlane.xlu0 %1574 }
 0x98a   : > { %v919_v61 = vpop.permute.xlu1 %918  ;;  %v915_v62 = vpop.xlane.xlu0 %914 }
 0x98b   : > { %2180 = vrcp.f32 %v915_v62  ;;  %2007 = vmatpush3.msra.mxu1 %v919_v61 }
 0x98c   : > { %2016 = vmatprep.subr.mxu1 %v2347_v0  ;;  %2182 = vrcp.f32 %v1080_v57 }
 0x98d   : > { %2184 = vrcp.f32 %v1245_v58 }
 0x98e   : > { %2186 = vrcp.f32 %v1410_v59  ;;  %v1084_v21 = vpop.permute.xlu0 %1083  ;;  %v1249_v2 = vpop.permute.xlu1 %1248 }
 0x98f   : > { %2188 = vrcp.f32 %v1575_v60 }
 0x992   : > { %v1414_v7 = vpop.permute.xlu1 %1413  ;;  %v1579_v10 = vpop.permute.xlu0 %1578 }
 0x996   : > { %v1656_v31 = vpop.permute.xlu1 %1655  ;;  %v1660_v32 = vpop.permute.xlu0 %1659 }
 0x997   : > { %v1682_v33 = vsel %vm338_vm2, %v2564_v36, %v1656_v31 }
 0x998   : > { %v2181_v63 = vpop.eup %2180  ;;  %v1684_v35 = vsel %vm1683_vm3, %v1682_v33, %v1660_v32 }
 0x999   : > { %v917_v51 = vmul.f32 %v2181_v63, %v2179_v55  ;;  %v2183_v1 = vpop.eup %2182 }
 0x99a   : > { %v1082_v3 = vmul.f32 %v2183_v1, %v2635_v26  ;;  %v2185_v4 = vpop.eup %2184 }
 0x99b   : > { %2009 = vmatmul.mubr.msk.f32.vlgmr.msra.gmra.mxu1 %vm338_vm2, %v917_v51  ;;  %v1247_v5 = vmul.f32 %v2185_v4, %v2173_v48  ;;  %v2187_v6 = vpop.eup %2186 }
 0x99c   : > { %2017 = vmatpush3.msra.mxu1 %v1084_v21  ;;  %2018 = vmatprep.mubr.msk.f32.mxu1 %vm2348_vm1, %v2347_v0  ;;  %v1412_v8 = vmul.f32 %v2187_v6, %v2177_v52  ;;  %v2189_v9 = vpop.eup %2188 }
 0x99d   : > { %2026 = vmatprep.subr.mxu1 %v2347_v0  ;;  %v1577_v11 = vmul.f32 %v2189_v9, %v2175_v50 }
 0x99f   : > { %2019 = vmatmul.mubr.msk.f32.vlgmr.msra.gmra.mxu1 %vm338_vm2, %v1082_v3 }
 0x9a0   : > { %2027 = vmatpush3.msra.mxu1 %v1249_v2  ;;  %2028 = vmatprep.mubr.msk.f32.mxu1 %vm2348_vm1, %v2347_v0 }
 0x9a1   : > { %2036 = vmatprep.subr.mxu1 %v2347_v0 }
 0x9a3   : > { %2029 = vmatmul.mubr.msk.f32.vlgmr.msra.gmra.mxu1 %vm338_vm2, %v1247_v5 }
 0x9a4   : > { %2037 = vmatpush3.msra.mxu1 %v1414_v7  ;;  %2038 = vmatprep.mubr.msk.f32.mxu1 %vm2348_vm1, %v2347_v0 }
 0x9a5   : > { %2046 = vmatprep.subr.mxu1 %v2347_v0 }
 0x9a7   : > { %2039 = vmatmul.mubr.msk.f32.vlgmr.msra.gmra.mxu1 %vm338_vm2, %v1412_v8 }
 0x9a8   : > { %2047 = vmatpush3.msra.mxu1 %v1579_v10  ;;  %2048 = vmatprep.mubr.msk.f32.mxu1 %vm2348_vm1, %v2347_v0 }
 0x9ab   : > { %2049 = vmatmul.mubr.msk.f32.vlgmr.msra.gmra.mxu1 %vm338_vm2, %v1577_v11 }
 0xa5b   : > { %v990_v17 = vpop.f32.mrf.mxu1 }
 0xa5c   : > { %1663 = vrot.lane.b32.xlu1 %v990_v17, %s2357_s27  ;;  %s1785_s27 = scalar_lea.sflag [#allocation4], %s2508_s6 }
 0xa5d   : > { %v2010_v20 = vpop.f32.mrf.mxu1 }
 0xa5f   : > { %v1155_v22 = vpop.f32.mrf.mxu1 }
 0xa60   : > { %1667 = vrot.lane.b32.xlu0 %v1155_v22, %s2355_s14 }
 0xa61   : > { %v2020_v24 = vpop.f32.mrf.mxu1 }
 0xa63   : > { %v1320_v25 = vpop.f32.mrf.mxu1 }
 0xa64   : > { %1671 = vrot.lane.b32.xlu1 %v1320_v25, %s2360_s29 }
 0xa65   : > { %v2030_v26 = vpop.f32.mrf.mxu1 }
 0xa67   : > { %v1485_v27 = vpop.f32.mrf.mxu1 }
 0xa68   : > { %1675 = vrot.lane.b32.xlu0 %v1485_v27, %s2353_s8  ;;  %s1798_s8 = sshll.u32 %s241_s7, 4  ;;  %s1799_s8 = int_to_ptr.vmem [resolvable:$true] %s1798_s8 }
 0xa69   : > { %v2040_v28 = vpop.f32.mrf.mxu1  ;;  %s2270_s28 = scalar_lea.vmem %s1799_s8, 128  ;;  %p2277_p6 = scmp.lt.s32.totalorder %s1799_s8, %s2275_s10 }
 0xa6a   : > { %p2271_p11 = scmp.ne.s32.totalorder %s1799_s8, %s2270_s28  ;;  %p2278_p12 = scmp.lt.s32.totalorder %s2276_s26, %s2270_s28 }
 0xa6b   : > { %v1650_v29 = vpop.f32.mrf.mxu1 }
 0xa6c   : > { %1679 = vrot.lane.b32.xlu1 %v1650_v29, %s2349_s21  ;;  %p2272_p1 = pnand %p2271_p11, %p2759_p0  ;;  %p2279_p3 = por %p2278_p12, %p2277_p6 }
 0xa6d   : > { %v2050_v30 = vpop.f32.mrf.mxu1 }
 0xa6e   : > { %p2273_p2 = pneg %p2272_p1 }
 0xa70   : > { %p2280_p9 = pnand %p2279_p3, %p2273_p2 }
 0xace   : > { %v1664_v0 = vpop.permute.xlu1 %1663 }
 0xacf   : > { %v1686_v38 = vsel %vm1685_vm4, %v1684_v35, %v1664_v0 }
 0xad2   : > { %v1668_v34 = vpop.permute.xlu0 %1667 }
 0xad3   : > { %v1688_v40 = vsel %vm1687_vm5, %v1686_v38, %v1668_v34 }
 0xad6   : > { %v1672_v37 = vpop.permute.xlu1 %1671 }
 0xad7   : > { %v1690_v41 = vsel %vm1689_vm6, %v1688_v40, %v1672_v37 }
 0xada   : > { %v1676_v39 = vpop.permute.xlu0 %1675 }
 0xadb   : > { %v1692_v42 = vsel %vm1691_vm7, %v1690_v41, %v1676_v39 }
 0xade   : > { %v1680_v43 = vpop.permute.xlu1 %1679 }
 0xadf   : > { %v1694_v36 = vsel %vm1693_vm8, %v1692_v42, %v1680_v43 }
 0xae0   : > { %2068 = vmatmul.mubr.msk.f32.vlgmr.msra.gmra.mxu0 %vm259_vm0, %v1694_v36 }
 0xba0   : > { %v1779_v45 = vpop.f32.mrf.mxu0 }
 0xba1   : > { %v1780_v46 = vadd.f32 %v1924_v44, %v1779_v45 }
 0xba2   : > { %v2069_v47 = vpop.f32.mrf.mxu0 }
 0xba3   : > { %1783 = vst.msk [vmem:[%s241_s7] sm:$0xff] %vm259_vm0, %v1780_v46 }
 0xba4   : > { %2283 = shalt.err (!%p2280_p9)
}
 0xba5   : > { %s2284_s29 = scalar_lea.hbm %s2701_s20, 128  ;;  %s2288_s11 = scalar_lea.hbm %s2743_s4, 256 }
 0xba6   : > { %p2285_p13 = scmp.ne.s32.totalorder %s2701_s20, %s2284_s29  ;;  %p2289_p4 = scmp.lt.s32.totalorder %s2701_s20, %s2743_s4 }
 0xba7   : > { %p2290_p8 = scmp.lt.s32.totalorder %s2288_s11, %s2284_s29 }
 0xba8   : > { %p2286_p5 = pnand %p2285_p13, %p2759_p0 }
 0xba9   : > { %p2291_p7 = por %p2290_p8, %p2289_p4 }
 0xbaa   : > { %p2287_p10 = pneg %p2286_p5 }
 0xbac   : > { %p2292_p11 = pnand %p2291_p7, %p2287_p10 }
 0xbae   : > { %2295 = shalt.err (!%p2292_p11)
}
 0xbaf   : > { %2080 = dma.vmem_to_hbm [thread:$0]  (%p2759_p0), %s1799_s8, 128, %s2701_s20, %s1785_s27  }
 0xbb0 PF: > { %s1810_s23 = sand.u32 1, %s2326_s15   ;;  %p2760_p1 = scmp.ne.s32.totalorder %s2749_s22, 0 }
 0xbb1   : > { %p2761_p2 = scmp.ge.s32.totalorder %s2338_s18, 2  ;;  %s1811_s5 = scalar_lea.sflag [#allocation4], %s1810_s23 }
 0xbb3   : > { %p2094_p6 = pnand %p2761_p2, %p2760_p1 }
 0xbb5   : > { %p2095_p12 = pneg %p2094_p6 }
 0xbb7   : > { %2321 = dma.done.wait (%p2095_p12), %s1811_s5, 128  }
 0xbb8   : > { %2323 = vsyncadd (%p2095_p12), %s1811_s5, 4294967168  ;;  %p18_p3 = scmp.ge.s32.totalorder %s2462_s13, 4   ;;  %s2762_s15 = smov %s2330_s16 }
 0xbb9   : > { %s2763_s16 = smov %s2334_s17  ;;  %s2764_s17 = smov %s2471_s24 }
 0xbba   : > { %s2765_s18 = smov %s2462_s13  ;;  %20 = sbr.rel (!%p18_p3) target bundleno = 6 (0x6), region = 89 }
 0xbbf   :  { %1816 = vsyncpa [#allocation3], 1 }
 0xbc0   :  { %1818 = vsyncpa [#allocation3 + $0x1], 1 }
 0xbc1   :  { %1819 = vsyncpa [#allocation6], 1 }
 0xbc2   :  { %1820 = vsyncpa [#allocation4], 1 }
 0xbc3   :  { %1822 = vsyncpa [#allocation4 + $0x1], 1 }

</bundles_post_ra>
